<compile_context>
chip_gen: v6e
topology: v6e:2x2x1
jax: 0.10.0
libtpu: 0.0.40
codegen_flags: <defaults>
</compile_context>

<pallas_src>
import math
import jax
import jax.numpy as jnp
from jax.experimental import pallas as pl
from jax.experimental.pallas import tpu as pltpu

BN_EPS = 1e-5
LANE = 128
NEG_INF = -1e30


# ---------------------------------------------------------------------------
# Fused Pallas kernel (all GCN layers in one call, packed params)
# ---------------------------------------------------------------------------
def _make_gcn_fused_kernel(num_layers, out_channels):
    """kernel(adj, x, w_slab, b_slab, out)"""

    def kernel(adj_ref, x_ref, w_ref, b_ref, o_ref):
        adj = adj_ref[...]          # bf16 (N, N); loaded once, reused every layer
        h = x_ref[...]              # bf16 (N, C_pad), lane-dense (zero-padded feats)
        b_all = b_ref[...]          # f32  (L, C_pad), zero in padded lanes

        y = None
        for i in range(num_layers):
            w = w_ref[i]            # bf16 (C_pad, C_pad); BN folded, zero-padded
            ah = jnp.dot(adj, h, preferred_element_type=jnp.float32)
            y = jnp.dot(ah.astype(jnp.bfloat16), w,
                        preferred_element_type=jnp.float32) + b_all[i:i + 1, :]
            if i < num_layers - 1:
                # Eval-mode BN folded on host; dropout is identity in eval.
                # TODO(synk): training-mode dropout / batch-stat BN not implemented.
                h = jnp.maximum(y, 0.0).astype(jnp.bfloat16)

        # Final-layer log_softmax in f32.  Padded logit lanes (>= out_channels)
        # came from zero weight columns / zero bias entries; mask them so the
        # softmax denominator only includes real classes.
        lane_idx = jax.lax.broadcasted_iota(jnp.int32, y.shape, 1)
        y = jnp.where(lane_idx < out_channels, y, NEG_INF)
        m = jnp.max(y, axis=-1, keepdims=True)
        z = y - m
        lse = jnp.log(jnp.sum(jnp.exp(z), axis=-1, keepdims=True))
        o_ref[...] = (z - lse)[:, :out_channels]

    return kernel


def _full_block(shape):
    # Full-array block; everything fits in VMEM at these sizes (grid=()).
    return pl.BlockSpec(shape, lambda: (0,) * len(shape))


# ---------------------------------------------------------------------------
# Host-side parameter prep + wrapper
# ---------------------------------------------------------------------------
def fold_bn_into_conv(w, b, gamma, beta, mean, var):
    """Eval-mode BatchNorm1d is a pure affine map: fold it into the linear."""
    scale = gamma * jax.lax.rsqrt(var + BN_EPS)
    return w * scale[None, :], (b - mean) * scale + beta


def _round_up(v, m):
    return ((v + m - 1) // m) * m


def gcn_forward(adj, x, convs, bns):
    num_layers = len(convs)
    N = x.shape[0]
    in_c = convs[0][0].shape[0]
    out_c = convs[-1][0].shape[1]

    # One lane-dense channel width for the whole stack (>= every layer's dim).
    c_pad = _round_up(max([in_c, out_c] + [w.shape[1] for w, _ in convs]), LANE)

    # Pack all (BN-folded) layer params into one weight slab + one bias slab.
    w_slab = jnp.zeros((num_layers, c_pad, c_pad), jnp.float32)
    b_slab = jnp.zeros((num_layers, c_pad), jnp.float32)
    for i, (w, b) in enumerate(convs):
        if i < num_layers - 1:
            w, b = fold_bn_into_conv(w, b, *bns[i])
        cin, cout = w.shape
        w_slab = w_slab.at[i, :cin, :cout].set(w)
        b_slab = b_slab.at[i, :cout].set(b)
    w_slab = w_slab.astype(jnp.bfloat16)                     # MXU-native weights

    adj_bf = adj.astype(jnp.bfloat16)
    x_pad = (jnp.zeros((N, c_pad), jnp.float32)
             .at[:, :in_c].set(x).astype(jnp.bfloat16))       # lane-dense features

    # Everything stays VMEM-resident for this single full-block call; budget it
    # explicitly (4x headroom, capped at 32 MiB -- safe on v5e / v6e / v7x).
    resident = (N * N * 2 + N * c_pad * 2
                + num_layers * c_pad * c_pad * 2
                + num_layers * c_pad * 4
                + N * c_pad * 4)
    vmem_limit = int(min(max(4 * resident, 4 << 20), 32 << 20))

    return pl.pallas_call(
        _make_gcn_fused_kernel(num_layers, out_c),
        out_shape=jax.ShapeDtypeStruct((N, out_c), jnp.float32),
        grid=(),
        in_specs=[_full_block(adj_bf.shape), _full_block(x_pad.shape),
                  _full_block(w_slab.shape), _full_block(b_slab.shape)],
        out_specs=_full_block((N, out_c)),
        compiler_params=pltpu.CompilerParams(vmem_limit_bytes=vmem_limit),
    )(adj_bf, x_pad, w_slab, b_slab)


# ---------------------------------------------------------------------------
# Pure-JAX f32 reference (eval-mode PyTorch forward) for tolerance checking
# ---------------------------------------------------------------------------
def gcn_reference(adj, x, convs, bns):
    h = x
    num_layers = len(convs)
    y = None
    for i, (w, b) in enumerate(convs):
        y = adj @ h @ w + b
        if i < num_layers - 1:
            gamma, beta, mean, var = bns[i]
            y = (y - mean) * (gamma * jax.lax.rsqrt(var + BN_EPS)) + beta
            h = jnp.maximum(y, 0.0)
    return jax.nn.log_softmax(y, axis=-1)


# ---------------------------------------------------------------------------
# Parameter init (deterministic: glorot for weights, zeros for biases)
# ---------------------------------------------------------------------------
def glorot(key, shape):
    fan_in, fan_out = shape
    std = math.sqrt(6.0 / (fan_in + fan_out))
    return jax.random.uniform(key, shape, jnp.float32, -std, std)


def init_gcn_params(key, in_channels, hidden_channels, out_channels, num_layers):
    dims = [in_channels] + [hidden_channels] * (num_layers - 1) + [out_channels]
    convs, bns = [], []
    for i in range(num_layers):
        key, wk = jax.random.split(key)
        w = glorot(wk, (dims[i], dims[i + 1]))
        b = jnp.zeros((dims[i + 1],), jnp.float32)
        convs.append((w, b))
        if i < num_layers - 1:
            c = dims[i + 1]
            bns.append((jnp.ones((c,), jnp.float32),    # gamma
                        jnp.zeros((c,), jnp.float32),   # beta
                        jnp.zeros((c,), jnp.float32),   # running_mean
                        jnp.ones((c,), jnp.float32)))   # running_var
    return convs, bns


# ---------------------------------------------------------------------------
# Main
# ---------------------------------------------------------------------------
if __name__ == "__main__":
    N = 64                 # number of nodes
    in_channels = 16
    hidden_channels = 32
    out_channels = 8
    num_layers = 3
    dropout = 0.5          # identity in eval mode

    key = jax.random.PRNGKey(0)
    k_adj, k_x, k_par = jax.random.split(key, 3)

    # Deterministic symmetric adjacency with self-loops, normalized as
    # adj = D^{-1/2} A D^{-1/2}   (host-side glue, plain JAX)
    a = (jax.random.uniform(k_adj, (N, N)) < 0.1).astype(jnp.float32)
    a = jnp.maximum(a, a.T)
    a = a + jnp.eye(N, dtype=jnp.float32)          # guarantee deg > 0
    deg = a.sum(axis=1)
    dis = deg ** -0.5
    adj = dis[:, None] * a * dis[None, :]

    x = jax.random.normal(k_x, (N, in_channels), jnp.float32)

    convs, bns = init_gcn_params(k_par, in_channels, hidden_channels,
                                 out_channels, num_layers)

    out = gcn_forward(adj, x, convs, bns)
    out = jax.block_until_ready(out)

    assert out.shape == (N, out_channels)
    # log_softmax rows should sum (in prob space) to ~1
    assert jnp.allclose(jnp.exp(out).sum(-1), 1.0, atol=1e-4)
    # bf16-kernel vs f32 reference tolerance check (per correctness review)
    ref = gcn_reference(adj, x, convs, bns)
    max_err = float(jnp.max(jnp.abs(out - ref)))
    assert max_err < 0.1, f"max |kernel - f32 ref| = {max_err}"
    print("KERNEL_OK")
</pallas_src>

<mosaic_0001>
module attributes {stable_mosaic.version = 11 : i64} {
  func.func @kernel(%arg0: memref<64x64xbf16, #tpu.memory_space<vmem>>, %arg1: memref<64x128xbf16, #tpu.memory_space<vmem>>, %arg2: memref<3x128x128xbf16, #tpu.memory_space<vmem>>, %arg3: memref<3x128xf32, #tpu.memory_space<vmem>>, %arg4: memref<64x8xf32, #tpu.memory_space<vmem>>) attributes {dimension_semantics = [], scalar_prefetch = 0 : i64, scratch_operands = 0 : i64, tpu.core_type = #tpu.core_type<tc>} {
    %c0 = arith.constant 0 : index
    %c0_0 = arith.constant 0 : index
    %0 = vector.load %arg0[%c0, %c0_0] : memref<64x64xbf16, #tpu.memory_space<vmem>>, vector<64x64xbf16>
    %c0_1 = arith.constant 0 : index
    %c0_2 = arith.constant 0 : index
    %1 = vector.load %arg1[%c0_1, %c0_2] : memref<64x128xbf16, #tpu.memory_space<vmem>>, vector<64x128xbf16>
    %c0_3 = arith.constant 0 : index
    %c0_4 = arith.constant 0 : index
    %2 = vector.load %arg3[%c0_3, %c0_4] : memref<3x128xf32, #tpu.memory_space<vmem>>, vector<3x128xf32>
    %c0_5 = arith.constant 0 : index
    %c0_6 = arith.constant 0 : index
    %c0_7 = arith.constant 0 : index
    %3 = vector.load %arg2[%c0_5, %c0_6, %c0_7] : memref<3x128x128xbf16, #tpu.memory_space<vmem>>, vector<1x128x128xbf16>
    %4 = vector.shape_cast %3 : vector<1x128x128xbf16> to vector<128x128xbf16>
    %cst = arith.constant dense<0.000000e+00> : vector<64x128xf32>
    %5 = tpu.matmul %0, %1, %cst {dimension_numbers = #tpu.dot_dimension_numbers<[1], [0], [0], [1], [0, 0, 1, 1], [], []>} : vector<64x64xbf16>, vector<64x128xbf16>, vector<64x128xf32> -> vector<64x128xf32>
    %6 = arith.truncf %5 : vector<64x128xf32> to vector<64x128xbf16>
    %cst_8 = arith.constant dense<0.000000e+00> : vector<64x128xf32>
    %7 = tpu.matmul %6, %4, %cst_8 {dimension_numbers = #tpu.dot_dimension_numbers<[1], [0], [0], [1], [0, 0, 1, 1], [], []>} : vector<64x128xbf16>, vector<128x128xbf16>, vector<64x128xf32> -> vector<64x128xf32>
    %8 = vector.extract_strided_slice %2 {offsets = [0, 0], sizes = [1, 128], strides = [1, 1]} : vector<3x128xf32> to vector<1x128xf32>
    %9 = vector.broadcast %8 : vector<1x128xf32> to vector<64x128xf32>
    %10 = arith.addf %7, %9 : vector<64x128xf32>
    %cst_9 = arith.constant 0.000000e+00 : f32
    %11 = vector.broadcast %cst_9 : f32 to vector<64x128xf32>
    %12 = arith.maximumf %10, %11 : vector<64x128xf32>
    %13 = arith.truncf %12 : vector<64x128xf32> to vector<64x128xbf16>
    %c1 = arith.constant 1 : index
    %c0_10 = arith.constant 0 : index
    %c0_11 = arith.constant 0 : index
    %14 = vector.load %arg2[%c1, %c0_10, %c0_11] : memref<3x128x128xbf16, #tpu.memory_space<vmem>>, vector<1x128x128xbf16>
    %15 = vector.shape_cast %14 : vector<1x128x128xbf16> to vector<128x128xbf16>
    %cst_12 = arith.constant dense<0.000000e+00> : vector<64x128xf32>
    %16 = tpu.matmul %0, %13, %cst_12 {dimension_numbers = #tpu.dot_dimension_numbers<[1], [0], [0], [1], [0, 0, 1, 1], [], []>} : vector<64x64xbf16>, vector<64x128xbf16>, vector<64x128xf32> -> vector<64x128xf32>
    %17 = arith.truncf %16 : vector<64x128xf32> to vector<64x128xbf16>
    %cst_13 = arith.constant dense<0.000000e+00> : vector<64x128xf32>
    %18 = tpu.matmul %17, %15, %cst_13 {dimension_numbers = #tpu.dot_dimension_numbers<[1], [0], [0], [1], [0, 0, 1, 1], [], []>} : vector<64x128xbf16>, vector<128x128xbf16>, vector<64x128xf32> -> vector<64x128xf32>
    %19 = vector.extract_strided_slice %2 {offsets = [1, 0], sizes = [1, 128], strides = [1, 1]} : vector<3x128xf32> to vector<1x128xf32>
    %20 = vector.broadcast %19 : vector<1x128xf32> to vector<64x128xf32>
    %21 = arith.addf %18, %20 : vector<64x128xf32>
    %cst_14 = arith.constant 0.000000e+00 : f32
    %22 = vector.broadcast %cst_14 : f32 to vector<64x128xf32>
    %23 = arith.maximumf %21, %22 : vector<64x128xf32>
    %24 = arith.truncf %23 : vector<64x128xf32> to vector<64x128xbf16>
    %c2 = arith.constant 2 : index
    %c0_15 = arith.constant 0 : index
    %c0_16 = arith.constant 0 : index
    %25 = vector.load %arg2[%c2, %c0_15, %c0_16] : memref<3x128x128xbf16, #tpu.memory_space<vmem>>, vector<1x128x128xbf16>
    %26 = vector.shape_cast %25 : vector<1x128x128xbf16> to vector<128x128xbf16>
    %cst_17 = arith.constant dense<0.000000e+00> : vector<64x128xf32>
    %27 = tpu.matmul %0, %24, %cst_17 {dimension_numbers = #tpu.dot_dimension_numbers<[1], [0], [0], [1], [0, 0, 1, 1], [], []>} : vector<64x64xbf16>, vector<64x128xbf16>, vector<64x128xf32> -> vector<64x128xf32>
    %28 = arith.truncf %27 : vector<64x128xf32> to vector<64x128xbf16>
    %cst_18 = arith.constant dense<0.000000e+00> : vector<64x128xf32>
    %29 = tpu.matmul %28, %26, %cst_18 {dimension_numbers = #tpu.dot_dimension_numbers<[1], [0], [0], [1], [0, 0, 1, 1], [], []>} : vector<64x128xbf16>, vector<128x128xbf16>, vector<64x128xf32> -> vector<64x128xf32>
    %30 = vector.extract_strided_slice %2 {offsets = [2, 0], sizes = [1, 128], strides = [1, 1]} : vector<3x128xf32> to vector<1x128xf32>
    %31 = vector.broadcast %30 : vector<1x128xf32> to vector<64x128xf32>
    %32 = arith.addf %29, %31 : vector<64x128xf32>
    %33 = tpu.iota {dimensions = array<i32: 1>} : vector<64x128xi32>
    %c8_i32 = arith.constant 8 : i32
    %34 = vector.broadcast %c8_i32 : i32 to vector<64x128xi32>
    %35 = arith.cmpi slt, %33, %34 : vector<64x128xi32>
    %cst_19 = arith.constant -1.000000e+30 : f32
    %36 = vector.broadcast %cst_19 : f32 to vector<64x128xf32>
    %37 = arith.select %35, %32, %36 : vector<64x128xi1>, vector<64x128xf32>
    %cst_20 = arith.constant dense<0xFF800000> : vector<64xf32>
    %38 = vector.multi_reduction <maximumf>, %37, %cst_20 [1] : vector<64x128xf32> to vector<64xf32>
    %39 = vector.shape_cast %38 : vector<64xf32> to vector<64x1xf32>
    %40 = vector.broadcast %39 : vector<64x1xf32> to vector<64x128xf32>
    %41 = arith.subf %37, %40 : vector<64x128xf32>
    %42 = math.exp %41 : vector<64x128xf32>
    %cst_21 = arith.constant dense<0.000000e+00> : vector<64xf32>
    %43 = vector.multi_reduction <add>, %42, %cst_21 [1] : vector<64x128xf32> to vector<64xf32>
    %44 = vector.shape_cast %43 : vector<64xf32> to vector<64x1xf32>
    %45 = math.log %44 : vector<64x1xf32>
    %46 = vector.broadcast %45 : vector<64x1xf32> to vector<64x128xf32>
    %47 = arith.subf %41, %46 : vector<64x128xf32>
    %48 = vector.extract_strided_slice %47 {offsets = [0, 0], sizes = [64, 8], strides = [1, 1]} : vector<64x128xf32> to vector<64x8xf32>
    %c0_22 = arith.constant 0 : index
    %c0_23 = arith.constant 0 : index
    %49 = vector.load %arg4[%c0_22, %c0_23] : memref<64x8xf32, #tpu.memory_space<vmem>>, vector<64x8xf32>
    tpu.vector_store %arg4[%c0_22, %c0_23], %48 {strides = array<i32>} : memref<64x8xf32, #tpu.memory_space<vmem>>, vector<64x8xf32>,
    return
  }
}

</mosaic_0001>

<bundles_post_ra>
// kernel: tpu_custom_call.1
= control target key start
LH: loop header
LB: loop body
LE: loop exit
PB: predicated region body
PF: predicated region fallthrough
CT: control target
= control target key end

     0   :  { %9 = vsyncpa [#allocation3], 0  ;;  %s1381_s0 = inlined_call_operand.hbm [shape: bf16[64,64], index: 0, kind: input, shape index: {}]   ;;  %s1382_s1 = inlined_call_operand.hbm [shape: bf16[64,128], index: 1, kind: input, shape index: {}]   ;;  %s1383_s2 = inlined_call_operand.hbm [shape: bf16[3,128,128], index: 2, kind: input, shape index: {}]   ;;  %s1384_s3 = inlined_call_operand.vmem [shape: f32[3,128], index: 3, kind: input, shape index: {}]   ;;  %s1385_s4 = inlined_call_operand.vmem [shape: f32[64,8], index: 4, kind: output, shape index: {}]  }
   0x1   :  { %10 = vsyncpa [#allocation5], 0  ;;  %s1228_s15 = smov [#allocation4]   ;;  %s1229_s17 = smov [#allocation2]  }
   0x2   :  { %s28_s16 = sshll.u32 %s1228_s15, 4  ;;  %s16_s18 = sshll.u32 %s1229_s17, 4  ;;  %s29_s16 = int_to_ptr.vmem [resolvable:$true] %s28_s16  ;;  %s17_s18 = int_to_ptr.vmem [resolvable:$true] %s16_s18 }
   0x3   :  { %s1172_s19 = scalar_lea.vmem %s29_s16, 512  ;;  %p1177_p1 = scmp.lt.s32.totalorder %s29_s16, %s29_s16 }
   0x4   :  { %p1173_p0 = scmp.ne.s32.totalorder %s29_s16, %s1172_s19  ;;  %p1178_p2 = scmp.lt.s32.totalorder %s1172_s19, %s1172_s19 }
   0x6   :  { %p1179_p3 = por %p1178_p2, %p1177_p1 }
   0x8   :  { %p1180_p4 = pnand %p1179_p3, %p1173_p0 }
   0xa   :  { %1183 = shalt.err (!%p1180_p4)
}
   0xb   :  { %s1230_s20 = smov 64   ;;  %s1231_s21 = smov 4  }
   0xc   :  { %34 = dma.hbm_to_vmem [thread:$0]  %s1382_s1, 512, %s29_s16, [#allocation5], %s1230_s20, %s1230_s20, %s1231_s21  }
   0xd   :  { %s1192_s24 = scalar_lea.vmem %s17_s18, 512  ;;  %p1197_p6 = scmp.lt.s32.totalorder %s17_s18, %s17_s18 }
   0xe   :  { %p1193_p5 = scmp.ne.s32.totalorder %s17_s18, %s1192_s24  ;;  %p1198_p7 = scmp.lt.s32.totalorder %s1192_s24, %s1192_s24 }
  0x10   :  { %p1199_p8 = por %p1198_p7, %p1197_p6 }
  0x12   :  { %p1200_p9 = pnand %p1199_p8, %p1193_p5 }
  0x14   :  { %1203 = shalt.err (!%p1200_p9)
}
  0x15   :  { %22 = dma.hbm_to_vmem [thread:$0]  %s1381_s0, 512, %s17_s18, [#allocation3], %s1230_s20, %s1230_s20, %s1231_s21  }
  0x16   :  { %s1232_s27 = smov [#allocation6]  }
  0x17   :  { %s40_s28 = sshll.u32 %s1232_s27, 4  ;;  %s41_s28 = int_to_ptr.vmem [resolvable:$true] %s40_s28 }
  0x18   :  { %s1212_s29 = scalar_lea.vmem %s41_s28, 3072  ;;  %p1217_p11 = scmp.lt.s32.totalorder %s41_s28, %s41_s28 }
  0x19   :  { %p1213_p10 = scmp.ne.s32.totalorder %s41_s28, %s1212_s29  ;;  %p1218_p12 = scmp.lt.s32.totalorder %s1212_s29, %s1212_s29 }
  0x1b   :  { %p1219_p13 = por %p1218_p12, %p1217_p11 }
  0x1d   :  { %p1220_p0 = pnand %p1219_p13, %p1213_p10 }
  0x1f   :  { %1223 = shalt.err (!%p1220_p0)
}
  0x20   :  { %46 = dma.hbm_to_vmem [thread:$0]  %s1383_s2, 3072, %s41_s28, [#allocation5], %s1230_s20, %s1230_s20, %s1231_s21  }
  0x21   :  { %1224 = dma.done.wait [#allocation3], 512  }
  0x22   :  { %1225 = vsyncadd [#allocation3], 4294966784 }
  0x23   :  { %1226 = dma.done.wait [#allocation5], 3584  }
  0x24   :  { %1227 = vsyncadd [#allocation5], 4294963712  ;;  %v1100_v0 = vld [vmem:[#allocation4 + $0x18] sm:$0xff]   ;;  %v1101_v1 = vld [vmem:[#allocation4 + $0x10] sm:$0xff]   ;;  %vm136_vm0 = vcmask 523264   ;;  %v218_v28 = vlaneseq  ;;  %vm856_vm2 = vcmask 64512  }
  0x25   :  { %975 = vmatprep.subr.bf16.mxu0 %v1100_v0  ;;  %v1102_v2 = vld [vmem:[#allocation4 + $0x8] sm:$0xff]   ;;  %v1104_v3 = vld [vmem:[#allocation2] sm:$0xff]   ;;  %v1108_v5 = vld [vmem:[#allocation6 + $0x38] sm:$0xff]  }
  0x26   :  { %976 = vmatpush3.bf16.msra.mxu0 %v1100_v0  ;;  %983 = vmatprep.mubr.msk.bf16.mxu0 %vm136_vm0, %v1104_v3  ;;  %v1103_v4 = vld [vmem:[#allocation4] sm:$0xff]   ;;  %v1109_v6 = vld [vmem:[#allocation6 + $0x30] sm:$0xff]   ;;  %v1268_v7 = vld [vmem:[#allocation2 + $0x8] sm:$0xff]   ;;  %v1283_v30 = vshrl.u32 %v218_v28, 7 }
  0x27   :  { %977 = vmatprep.subr.bf16.mxu0 %v1101_v1  ;;  %991 = vmatprep.subr.bf16.mxu1 %v1108_v5  ;;  %v1110_v8 = vld [vmem:[#allocation6 + $0x28] sm:$0xff]   ;;  %v1270_v9 = vld [vmem:[#allocation2 + $0x10] sm:$0xff]   ;;  %v1111_v10 = vld [vmem:[#allocation6 + $0x20] sm:$0xff]  }
  0x28   :  { %992 = vmatpush3.bf16.msra.mxu1 %v1108_v5  ;;  %v1112_v11 = vld [vmem:[#allocation6 + $0x18] sm:$0xff]   ;;  %v1113_v13 = vld [vmem:[#allocation6 + $0x10] sm:$0xff]   ;;  %v1114_v14 = vld [vmem:[#allocation6 + $0x8] sm:$0xff]   ;;  %v220_v33 = vsub.s32 0, %v1283_v30 }
  0x29   :  { %993 = vmatprep.subr.bf16.mxu1 %v1109_v6  ;;  %v1276_v12 = vld [vmem:[#allocation2 + $0x18] sm:$0xff]   ;;  %v1115_v15 = vld [vmem:[#allocation6] sm:$0xff]   ;;  %v1117_v62 = vld [vmem:[#allocation6 + $0x70] sm:$0xff]  }
  0x2a   :  { %978 = vmatpush3.bf16.msra.mxu0 %v1101_v1  ;;  %v1289_v34 = vld [vmem:[%s1384_s3] sm:$0x7]  ;;  %v1116_v61 = vld [vmem:[#allocation6 + $0x78] sm:$0xff]   ;;  %v1118_v63 = vld [vmem:[#allocation6 + $0x68] sm:$0xff]  }
  0x2b   :  { %979 = vmatprep.subr.bf16.mxu0 %v1102_v2  ;;  %v221_v37 = vrot.slane %v1289_v34, %v220_v33  ;;  %v1119_v0 = vld [vmem:[#allocation6 + $0x60] sm:$0xff]   ;;  %v1120_v1 = vld [vmem:[#allocation6 + $0x58] sm:$0xff]  }
  0x2c   :  { %994 = vmatpush3.bf16.msra.mxu1 %v1109_v6 }
  0x2d   :  { %995 = vmatprep.subr.bf16.mxu1 %v1110_v8 }
  0x2e   :  { %980 = vmatpush3.bf16.msra.mxu0 %v1102_v2  ;;  %v1121_v2 = vld [vmem:[#allocation6 + $0x50] sm:$0xff]  }
  0x2f   :  { %981 = vmatprep.subr.bf16.mxu0 %v1103_v4 }
  0x30   :  { %996 = vmatpush3.bf16.msra.mxu1 %v1110_v8 }
  0x31   :  { %997 = vmatprep.subr.bf16.mxu1 %v1111_v10 }
  0x32   :  { %982 = vmatpush3.bf16.msra.mxu0 %v1103_v4  ;;  %v1123_v4 = vld [vmem:[#allocation6 + $0x40] sm:$0xff]  }
  0x34   :  { %998 = vmatpush3.bf16.msra.mxu1 %v1111_v10 }
  0x35   :  { %984 = vmatmul.mubr.msk.bf16.vlgmr.msra.gmra.mxu0 %vm136_vm0, %v1268_v7  ;;  %999 = vmatprep.subr.bf16.mxu1 %v1112_v11 }
  0x36   :  { %987 = vmatprep.mubr.msk.bf16.mxu0 %vm136_vm0, %v1270_v9 }
  0x38   :  { %1000 = vmatpush3.bf16.msra.mxu1 %v1112_v11 }
  0x39   :  { %1001 = vmatprep.subr.bf16.mxu1 %v1113_v13 }
  0x3c   :  { %1002 = vmatpush3.bf16.msra.mxu1 %v1113_v13 }
  0x3d   :  { %988 = vmatmul.mubr.msk.bf16.gmra.mxu0 %vm136_vm0, %v1276_v12  ;;  %1003 = vmatprep.subr.bf16.mxu1 %v1114_v14 }
  0x3e   :  { %1023 = vmatprep.mubr.msk.bf16.mxu0 %vm136_vm0, %v1104_v3 }
  0x40   :  { %1004 = vmatpush3.bf16.msra.mxu1 %v1114_v14 }
  0x41   :  { %1005 = vmatprep.subr.bf16.mxu1 %v1115_v15 }
  0x44   :  { %1006 = vmatpush3.bf16.msra.mxu1 %v1115_v15 }
  0xf5   :  { %v985_v16 = vpop.f32.mrf.mxu0 }
  0xf7   :  { %v183_v17 = vpop.f32.mrf.mxu0 }
  0xf9   :  { %v986_v18 = vpop.f32.mrf.mxu0 }
  0xfa   :  { %v215_v21 = vpack.c.bf16 %v986_v18, %v985_v16 }
  0xfb   :  { %v186_v19 = vpop.f32.mrf.mxu0 }
  0xfc   :  { %v214_v20 = vpack.c.bf16 %v186_v19, %v183_v17 }
  0xfd   :  { %v989_v22 = vpop.f32.mrf.mxu0 }
  0xfe   :  { %1007 = vmatprep.mubr.bf16.mxu1 %v214_v20 }
  0xff   :  { %v199_v23 = vpop.f32.mrf.mxu0  ;;  %1008 = vmatmul.mubr.bf16.vlgmr.msra.gmra.mxu1 %v215_v21 }
 0x101   :  { %v990_v24 = vpop.f32.mrf.mxu0 }
 0x102   :  { %v217_v27 = vpack.c.bf16 %v990_v24, %v989_v22 }
 0x103   :  { %v202_v25 = vpop.f32.mrf.mxu0 }
 0x104   :  { %v216_v26 = vpack.c.bf16 %v202_v25, %v199_v23  ;;  %v435_v23 = vsub.s32 1, %v1283_v30 }
 0x106   :  { %1011 = vmatprep.mubr.bf16.mxu1 %v216_v26  ;;  %v436_v26 = vrot.slane %v1289_v34, %v435_v23 }
 0x107   :  { %1012 = vmatmul.mubr.bf16.gmra.mxu1 %v217_v27 }
 0x108   :  { %1063 = vmatprep.mubr.msk.bf16.mxu1 %vm136_vm0, %v1104_v3  ;;  %v1122_v3 = vld [vmem:[#allocation6 + $0x48] sm:$0xff]  }
 0x1bf   :  { %v1009_v29 = vpop.f32.mrf.mxu1 }
 0x1c0   :  { %v313_v48 = vadd.f32 %v1009_v29, %v221_v37 }
 0x1c1   :  { %v304_v31 = vpop.f32.mrf.mxu1 }
 0x1c2   :  { %v337_v55 = vmax.f32 %v313_v48, 0.0  ;;  %v305_v56 = vadd.f32 %v304_v31, %v221_v37 }
 0x1c3   :  { %v1010_v32 = vpop.f32.mrf.mxu1 }
 0x1c4   :  { %v316_v44 = vadd.f32 %v1010_v32, %v221_v37  ;;  %v335_v59 = vmax.f32 %v305_v56, 0.0  ;;  %v1127_v56 = vld [vmem:[#allocation6 + $0xa0] sm:$0xff]  }
 0x1c5   :  { %v307_v35 = vpop.f32.mrf.mxu1 }
 0x1c6   :  { %v338_v52 = vmax.f32 %v316_v44, 0.0  ;;  %v308_v53 = vadd.f32 %v307_v35, %v221_v37 }
 0x1c7   :  { %v1013_v36 = vpop.f32.mrf.mxu1 }
 0x1c8   :  { %v329_v39 = vadd.f32 %v1013_v36, %v221_v37  ;;  %v344_v57 = vpack.c.bf16 %v338_v52, %v337_v55  ;;  %v336_v58 = vmax.f32 %v308_v53, 0.0  ;;  %v1124_v53 = vld [vmem:[#allocation6 + $0xb8] sm:$0xff]   ;;  %v1126_v55 = vld [vmem:[#allocation6 + $0xa8] sm:$0xff]  }
 0x1c9   :  { %v320_v38 = vpop.f32.mrf.mxu1 }
 0x1ca   :  { %v321_v41 = vadd.f32 %v320_v38, %v221_v37  ;;  %v341_v45 = vmax.f32 %v329_v39, 0.0  ;;  %v343_v60 = vpack.c.bf16 %v336_v58, %v335_v59  ;;  %v1129_v58 = vld [vmem:[#allocation6 + $0x90] sm:$0xff]  }
 0x1cb   :  { %v1014_v40 = vpop.f32.mrf.mxu1 }
 0x1cc   :  { %v332_v42 = vadd.f32 %v1014_v40, %v221_v37  ;;  %v339_v49 = vmax.f32 %v321_v41, 0.0 }
 0x1cd   :  { %v323_v43 = vpop.f32.mrf.mxu1 }
 0x1ce   :  { %v342_v46 = vmax.f32 %v332_v42, 0.0  ;;  %v324_v47 = vadd.f32 %v323_v43, %v221_v37 }
 0x1d0   :  { %v346_v50 = vpack.c.bf16 %v342_v46, %v341_v45  ;;  %v340_v51 = vmax.f32 %v324_v47, 0.0 }
 0x1d2   :  { %v345_v54 = vpack.c.bf16 %v340_v51, %v339_v49  ;;  %1015 = vmatprep.subr.bf16.mxu0 %v346_v50 }
 0x1d3   :  { %1016 = vmatpush3.bf16.msra.mxu0 %v346_v50 }
 0x1d4   :  { %1017 = vmatprep.subr.bf16.mxu0 %v345_v54 }
 0x1d7   :  { %1018 = vmatpush3.bf16.msra.mxu0 %v345_v54  ;;  %v1125_v54 = vld [vmem:[#allocation6 + $0xb0] sm:$0xff]  }
 0x1d8   :  { %1019 = vmatprep.subr.bf16.mxu0 %v344_v57 }
 0x1db   :  { %1020 = vmatpush3.bf16.msra.mxu0 %v344_v57  ;;  %v1128_v57 = vld [vmem:[#allocation6 + $0x98] sm:$0xff]  }
 0x1dc   :  { %1021 = vmatprep.subr.bf16.mxu0 %v343_v60 }
 0x1df   :  { %1022 = vmatpush3.bf16.msra.mxu0 %v343_v60 }
 0x1e0   :  { %1031 = vmatprep.subr.bf16.mxu0 %v1116_v61 }
 0x1e2   :  { %1024 = vmatmul.mubr.msk.bf16.vlgmr.msra.gmra.mxu0 %vm136_vm0, %v1268_v7 }
 0x1e3   :  { %1027 = vmatprep.mubr.msk.bf16.mxu0 %vm136_vm0, %v1270_v9  ;;  %1032 = vmatpush3.bf16.msra.mxu0 %v1116_v61 }
 0x1e4   :  { %1033 = vmatprep.subr.bf16.mxu0 %v1117_v62 }
 0x1e7   :  { %1034 = vmatpush3.bf16.msra.mxu0 %v1117_v62 }
 0x1e8   :  { %1035 = vmatprep.subr.bf16.mxu0 %v1118_v63 }
 0x1ea   :  { %1028 = vmatmul.mubr.msk.bf16.gmra.mxu0 %vm136_vm0, %v1276_v12 }
 0x1eb   :  { %1036 = vmatpush3.bf16.msra.mxu0 %v1118_v63 }
 0x1ec   :  { %1037 = vmatprep.subr.bf16.mxu0 %v1119_v0 }
 0x1ef   :  { %1038 = vmatpush3.bf16.msra.mxu0 %v1119_v0 }
 0x1f0   :  { %1039 = vmatprep.subr.bf16.mxu0 %v1120_v1 }
 0x1f3   :  { %1040 = vmatpush3.bf16.msra.mxu0 %v1120_v1 }
 0x1f4   :  { %1041 = vmatprep.subr.bf16.mxu0 %v1121_v2 }
 0x1f7   :  { %1042 = vmatpush3.bf16.msra.mxu0 %v1121_v2 }
 0x1f8   :  { %1043 = vmatprep.subr.bf16.mxu0 %v1122_v3 }
 0x1fb   :  { %1044 = vmatpush3.bf16.msra.mxu0 %v1122_v3 }
 0x1fc   :  { %1045 = vmatprep.subr.bf16.mxu0 %v1123_v4 }
 0x1ff   :  { %1046 = vmatpush3.bf16.msra.mxu0 %v1123_v4 }
 0x2a2   :  { %v1025_v5 = vpop.f32.mrf.mxu0 }
 0x2a4   :  { %v398_v6 = vpop.f32.mrf.mxu0 }
 0x2a6   :  { %v1026_v8 = vpop.f32.mrf.mxu0 }
 0x2a7   :  { %v430_v13 = vpack.c.bf16 %v1026_v8, %v1025_v5  ;;  %v766_v8 = vand.u32 127, %v218_v28 }
 0x2a8   :  { %v401_v10 = vpop.f32.mrf.mxu0 }
 0x2a9   :  { %v429_v11 = vpack.c.bf16 %v401_v10, %v398_v6  ;;  %v650_v6 = vsub.s32 2, %v1283_v30  ;;  %vm767_vm1 = vcmp.lt.s32.totalorder %v766_v8, 8 }
 0x2aa   :  { %v1029_v14 = vpop.f32.mrf.mxu0 }
 0x2ab   :  { %1047 = vmatprep.mubr.bf16.mxu0 %v429_v11  ;;  %v651_v10 = vrot.slane %v1289_v34, %v650_v6 }
 0x2ac   :  { %v414_v15 = vpop.f32.mrf.mxu0  ;;  %1048 = vmatmul.mubr.bf16.vlgmr.msra.gmra.mxu0 %v430_v13 }
 0x2ae   :  { %v1030_v16 = vpop.f32.mrf.mxu0 }
 0x2af   :  { %v432_v19 = vpack.c.bf16 %v1030_v16, %v1029_v14 }
 0x2b0   :  { %v417_v17 = vpop.f32.mrf.mxu0 }
 0x2b1   :  { %v431_v18 = vpack.c.bf16 %v417_v17, %v414_v15 }
 0x2b3   :  { %1051 = vmatprep.mubr.bf16.mxu0 %v431_v18 }
 0x2b4   :  { %1052 = vmatmul.mubr.bf16.gmra.mxu0 %v432_v19 }
 0x36c   :  { %v1049_v20 = vpop.f32.mrf.mxu0 }
 0x36d   :  { %v528_v40 = vadd.f32 %v1049_v20, %v436_v26 }
 0x36e   :  { %v519_v21 = vpop.f32.mrf.mxu0 }
 0x36f   :  { %v552_v47 = vmax.f32 %v528_v40, 0.0  ;;  %v520_v48 = vadd.f32 %v519_v21, %v436_v26 }
 0x370   :  { %v1050_v22 = vpop.f32.mrf.mxu0 }
 0x371   :  { %v531_v36 = vadd.f32 %v1050_v22, %v436_v26  ;;  %v550_v51 = vmax.f32 %v520_v48, 0.0 }
 0x372   :  { %v522_v24 = vpop.f32.mrf.mxu0 }
 0x373   :  { %v553_v44 = vmax.f32 %v531_v36, 0.0  ;;  %v523_v45 = vadd.f32 %v522_v24, %v436_v26 }
 0x374   :  { %v1053_v25 = vpop.f32.mrf.mxu0 }
 0x375   :  { %v544_v29 = vadd.f32 %v1053_v25, %v436_v26  ;;  %v559_v49 = vpack.c.bf16 %v553_v44, %v552_v47  ;;  %v551_v50 = vmax.f32 %v523_v45, 0.0 }
 0x376   :  { %v535_v27 = vpop.f32.mrf.mxu0 }
 0x377   :  { %v536_v32 = vadd.f32 %v535_v27, %v436_v26  ;;  %v556_v37 = vmax.f32 %v544_v29, 0.0  ;;  %v558_v52 = vpack.c.bf16 %v551_v50, %v550_v51 }
 0x378   :  { %v1054_v31 = vpop.f32.mrf.mxu0 }
 0x379   :  { %v547_v33 = vadd.f32 %v1054_v31, %v436_v26  ;;  %v554_v41 = vmax.f32 %v536_v32, 0.0 }
 0x37a   :  { %v538_v35 = vpop.f32.mrf.mxu0 }
 0x37b   :  { %v557_v38 = vmax.f32 %v547_v33, 0.0  ;;  %v539_v39 = vadd.f32 %v538_v35, %v436_v26 }
 0x37d   :  { %v561_v42 = vpack.c.bf16 %v557_v38, %v556_v37  ;;  %v555_v43 = vmax.f32 %v539_v39, 0.0 }
 0x37f   :  { %v560_v46 = vpack.c.bf16 %v555_v43, %v554_v41  ;;  %1055 = vmatprep.subr.bf16.mxu1 %v561_v42 }
 0x380   :  { %1056 = vmatpush3.bf16.msra.mxu1 %v561_v42 }
 0x381   :  { %1057 = vmatprep.subr.bf16.mxu1 %v560_v46 }
 0x384   :  { %1058 = vmatpush3.bf16.msra.mxu1 %v560_v46 }
 0x385   :  { %1059 = vmatprep.subr.bf16.mxu1 %v559_v49 }
 0x388   :  { %1060 = vmatpush3.bf16.msra.mxu1 %v559_v49 }
 0x389   :  { %1061 = vmatprep.subr.bf16.mxu1 %v558_v52 }
 0x38c   :  { %1062 = vmatpush3.bf16.msra.mxu1 %v558_v52 }
 0x38d   :  { %1071 = vmatprep.subr.bf16.mxu1 %v1124_v53 }
 0x38f   :  { %1064 = vmatmul.mubr.msk.bf16.vlgmr.msra.gmra.mxu1 %vm136_vm0, %v1268_v7  ;;  %v1130_v7 = vld [vmem:[#allocation6 + $0x88] sm:$0xff]  }
 0x390   :  { %1067 = vmatprep.mubr.msk.bf16.mxu1 %vm136_vm0, %v1270_v9  ;;  %1072 = vmatpush3.bf16.msra.mxu1 %v1124_v53  ;;  %v1131_v9 = vld [vmem:[#allocation6 + $0x80] sm:$0xff]  }
 0x391   :  { %1073 = vmatprep.subr.bf16.mxu1 %v1125_v54 }
 0x394   :  { %1074 = vmatpush3.bf16.msra.mxu1 %v1125_v54 }
 0x395   :  { %1075 = vmatprep.subr.bf16.mxu1 %v1126_v55 }
 0x397   :  { %1068 = vmatmul.mubr.msk.bf16.gmra.mxu1 %vm136_vm0, %v1276_v12 }
 0x398   :  { %1076 = vmatpush3.bf16.msra.mxu1 %v1126_v55 }
 0x399   :  { %1077 = vmatprep.subr.bf16.mxu1 %v1127_v56 }
 0x39c   :  { %1078 = vmatpush3.bf16.msra.mxu1 %v1127_v56 }
 0x39d   :  { %1079 = vmatprep.subr.bf16.mxu1 %v1128_v57 }
 0x3a0   :  { %1080 = vmatpush3.bf16.msra.mxu1 %v1128_v57 }
 0x3a1   :  { %1081 = vmatprep.subr.bf16.mxu1 %v1129_v58 }
 0x3a4   :  { %1082 = vmatpush3.bf16.msra.mxu1 %v1129_v58 }
 0x3a5   :  { %1083 = vmatprep.subr.bf16.mxu1 %v1130_v7 }
 0x3a8   :  { %1084 = vmatpush3.bf16.msra.mxu1 %v1130_v7 }
 0x3a9   :  { %1085 = vmatprep.subr.bf16.mxu1 %v1131_v9 }
 0x3ac   :  { %1086 = vmatpush3.bf16.msra.mxu1 %v1131_v9 }
 0x44f   :  { %v1065_v59 = vpop.f32.mrf.mxu1 }
 0x451   :  { %v613_v60 = vpop.f32.mrf.mxu1 }
 0x453   :  { %v1066_v61 = vpop.f32.mrf.mxu1 }
 0x454   :  { %v645_v63 = vpack.c.bf16 %v1066_v61, %v1065_v59 }
 0x455   :  { %v616_v62 = vpop.f32.mrf.mxu1 }
 0x456   :  { %v644_v12 = vpack.c.bf16 %v616_v62, %v613_v60 }
 0x457   :  { %v1069_v0 = vpop.f32.mrf.mxu1 }
 0x458   :  { %1087 = vmatprep.mubr.bf16.mxu1 %v644_v12 }
 0x459   :  { %v629_v1 = vpop.f32.mrf.mxu1  ;;  %1088 = vmatmul.mubr.bf16.vlgmr.msra.gmra.mxu1 %v645_v63 }
 0x45b   :  { %v1070_v2 = vpop.f32.mrf.mxu1 }
 0x45c   :  { %v647_v5 = vpack.c.bf16 %v1070_v2, %v1069_v0 }
 0x45d   :  { %v632_v3 = vpop.f32.mrf.mxu1 }
 0x45e   :  { %v646_v4 = vpack.c.bf16 %v632_v3, %v629_v1 }
 0x460   :  { %1091 = vmatprep.mubr.bf16.mxu1 %v646_v4 }
 0x461   :  { %1092 = vmatmul.mubr.bf16.gmra.mxu1 %v647_v5 }
 0x519   :  { %v1089_v11 = vpop.f32.mrf.mxu1 }
 0x51a   :  { %v743_v13 = vadd.f32 %v1089_v11, %v651_v10 }
 0x51b   :  { %v734_v14 = vpop.f32.mrf.mxu1 }
 0x51c   :  { %v735_v15 = vadd.f32 %v734_v14, %v651_v10  ;;  %v770_v16 = vsel %vm767_vm1, %v743_v13, -1e+30 }
 0x51d   :  { %780 = vmax.xlane.f32.xlu1 %v770_v16  ;;  %v1090_v17 = vpop.f32.mrf.mxu1 }
 0x51e   :  { %v746_v18 = vadd.f32 %v1090_v17, %v651_v10  ;;  %v768_v19 = vsel %vm767_vm1, %v735_v15, -1e+30 }
 0x51f   :  { %v737_v20 = vpop.f32.mrf.mxu1  ;;  %776 = vmax.xlane.f32.xlu0 %v768_v19 }
 0x520   :  { %v738_v21 = vadd.f32 %v737_v20, %v651_v10  ;;  %v771_v30 = vsel %vm767_vm1, %v746_v18, -1e+30 }
 0x521   :  { %782 = vmax.xlane.f32.xlu1 %v771_v30  ;;  %v1093_v28 = vpop.f32.mrf.mxu1 }
 0x522   :  { %v769_v34 = vsel %vm767_vm1, %v738_v21, -1e+30  ;;  %v759_v25 = vadd.f32 %v1093_v28, %v651_v10 }
 0x523   :  { %778 = vmax.xlane.f32.xlu0 %v769_v34  ;;  %v750_v22 = vpop.f32.mrf.mxu1 }
 0x524   :  { %v751_v23 = vadd.f32 %v750_v22, %v651_v10  ;;  %v774_v33 = vsel %vm767_vm1, %v759_v25, -1e+30 }
 0x525   :  { %v1094_v24 = vpop.f32.mrf.mxu1 }
 0x526   :  { %v772_v26 = vsel %vm767_vm1, %v751_v23, -1e+30  ;;  %v762_v31 = vadd.f32 %v1094_v24, %v651_v10 }
 0x527   :  { %v753_v27 = vpop.f32.mrf.mxu1  ;;  %784 = vmax.xlane.f32.xlu0 %v772_v26 }
 0x528   :  { %v754_v29 = vadd.f32 %v753_v27, %v651_v10  ;;  %v775_v35 = vsel %vm767_vm1, %v762_v31, -1e+30 }
 0x52a   :  { %v773_v32 = vsel %vm767_vm1, %v754_v29, -1e+30 }
 0x52b   :  { %786 = vmax.xlane.f32.xlu1 %v773_v32  ;;  %788 = vmax.xlane.f32.xlu0 %v774_v33 }
 0x52f   :  { %790 = vmax.xlane.f32.xlu1 %v775_v35 }
 0x5a6   :  { %v781_v36 = vpop.xlane.xlu1 %780 }
 0x5a7   :  { %v1317_v37 = vsub.f32 %v770_v16, %v781_v36 }
 0x5a8   :  { %v777_v38 = vpop.xlane.xlu0 %776 }
 0x5a9   :  { %v804_v39 = vmul.f32 1.442695, %v1317_v37  ;;  %v1320_v40 = vsub.f32 %v768_v19, %v777_v38 }
 0x5aa   :  { %v783_v41 = vpop.xlane.xlu1 %782 }
 0x5ab   :  { %1132 = vpow2.f32 %v804_v39  ;;  %v800_v42 = vmul.f32 1.442695, %v1320_v40  ;;  %v1323_v43 = vsub.f32 %v771_v30, %v783_v41 }
 0x5ac   :  { %v779_v44 = vpop.xlane.xlu0 %778 }
 0x5ad   :  { %v806_v45 = vmul.f32 1.442695, %v1323_v43  ;;  %v1326_v46 = vsub.f32 %v769_v34, %v779_v44  ;;  %1134 = vpow2.f32 %v800_v42 }
 0x5af   :  { %1136 = vpow2.f32 %v806_v45  ;;  %v802_v47 = vmul.f32 1.442695, %v1326_v46 }
 0x5b0   :  { %v785_v48 = vpop.xlane.xlu0 %784 }
 0x5b1   :  { %v1329_v49 = vsub.f32 %v772_v26, %v785_v48  ;;  %1138 = vpow2.f32 %v802_v47 }
 0x5b3   :  { %v808_v50 = vmul.f32 1.442695, %v1329_v49 }
 0x5b4   :  { %v787_v51 = vpop.xlane.xlu1 %786  ;;  %v789_v52 = vpop.xlane.xlu0 %788 }
 0x5b5   :  { %1140 = vpow2.f32 %v808_v50  ;;  %v1332_v53 = vsub.f32 %v773_v32, %v787_v51  ;;  %v1334_v54 = vsub.f32 %v774_v33, %v789_v52 }
 0x5b7   :  { %v810_v55 = vmul.f32 1.442695, %v1332_v53  ;;  %v812_v56 = vmul.f32 1.442695, %v1334_v54 }
 0x5b8   :  { %v1133_v57 = vpop.eup %1132  ;;  %v791_v58 = vpop.xlane.xlu1 %790 }
 0x5b9   :  { %1142 = vpow2.f32 %v810_v55  ;;  %v1338_v7 = vsub.f32 %v775_v35, %v791_v58  ;;  %820 = vadd.xlane.f32.xlu0 %v1133_v57 }
 0x5ba   :  { %1144 = vpow2.f32 %v812_v56  ;;  %v1135_v9 = vpop.eup %1134 }
 0x5bb   :  { %v814_v59 = vmul.f32 1.442695, %v1338_v7 }
 0x5bc   :  { %v1137_v60 = vpop.eup %1136 }
 0x5bd   :  { %1146 = vpow2.f32 %v814_v59  ;;  %822 = vadd.xlane.f32.xlu1 %v1137_v60  ;;  %816 = vadd.xlane.f32.xlu0 %v1135_v9 }
 0x5be   :  { %v1139_v61 = vpop.eup %1138 }
 0x5c1   :  { %818 = vadd.xlane.f32.xlu1 %v1139_v61 }
 0x5c2   :  { %v1141_v62 = vpop.eup %1140 }
 0x5c3   :  { %824 = vadd.xlane.f32.xlu0 %v1141_v62 }
 0x5c6   :  { %v1143_v12 = vpop.eup %1142 }
 0x5c7   :  { %v1145_v63 = vpop.eup %1144  ;;  %826 = vadd.xlane.f32.xlu1 %v1143_v12 }
 0x5c8   :  { %828 = vadd.xlane.f32.xlu0 %v1145_v63 }
 0x5ca   :  { %v1147_v0 = vpop.eup %1146 }
 0x5cb   :  { %830 = vadd.xlane.f32.xlu1 %v1147_v0 }
 0x642   :  { %v821_v1 = vpop.xlane.xlu0 %820 }
 0x643   :  { %1148 = vlog2.f32 %v821_v1 }
 0x646   :  { %v823_v2 = vpop.xlane.xlu1 %822  ;;  %v817_v3 = vpop.xlane.xlu0 %816 }
 0x647   :  { %1150 = vlog2.f32 %v823_v2 }
 0x648   :  { %1152 = vlog2.f32 %v817_v3 }
 0x64a   :  { %v819_v4 = vpop.xlane.xlu1 %818 }
 0x64b   :  { %1154 = vlog2.f32 %v819_v4 }
 0x64c   :  { %v825_v5 = vpop.xlane.xlu0 %824 }
 0x64d   :  { %1156 = vlog2.f32 %v825_v5 }
 0x650   :  { %v1149_v6 = vpop.eup %1148  ;;  %v827_v8 = vpop.xlane.xlu1 %826 }
 0x651   :  { %v837_v10 = vmul.f32 0.6931472, %v1149_v6  ;;  %1158 = vlog2.f32 %v827_v8  ;;  %v829_v11 = vpop.xlane.xlu0 %828 }
 0x652   :  { %1160 = vlog2.f32 %v829_v11 }
 0x653   :  { %v850_v13 = vsub.f32 %v1317_v37, %v837_v10 }
 0x654   :  { %v1151_v14 = vpop.eup %1150  ;;  %v831_v15 = vpop.xlane.xlu1 %830 }
 0x655   :  { %v1153_v16 = vpop.eup %1152  ;;  %859 = vst.msk [vmem:[%s1385_s4 + $0x10] sm:$0xff] %vm856_vm2, %v850_v13  ;;  %v839_v17 = vmul.f32 0.6931472, %v1151_v14  ;;  %1162 = vlog2.f32 %v831_v15 }
 0x656   :  { %v833_v18 = vmul.f32 0.6931472, %v1153_v16 }
 0x657   :  { %v851_v19 = vsub.f32 %v1323_v43, %v839_v17 }
 0x658   :  { %v1155_v20 = vpop.eup %1154  ;;  %v848_v21 = vsub.f32 %v1320_v40, %v833_v18 }
 0x659   :  { %860 = vst.msk [vmem:[%s1385_s4 + $0x18] sm:$0xff] %vm856_vm2, %v851_v19  ;;  %v835_v30 = vmul.f32 0.6931472, %v1155_v20 }
 0x65a   :  { %v1157_v28 = vpop.eup %1156  ;;  %857 = vst.msk [vmem:[%s1385_s4] sm:$0xff] %vm856_vm2, %v848_v21 }
 0x65b   :  { %v849_v34 = vsub.f32 %v1326_v46, %v835_v30  ;;  %v841_v22 = vmul.f32 0.6931472, %v1157_v28 }
 0x65d   :  { %858 = vst.msk [vmem:[%s1385_s4 + $0x8] sm:$0xff] %vm856_vm2, %v849_v34  ;;  %v852_v23 = vsub.f32 %v1329_v49, %v841_v22 }
 0x65e   :  { %v1159_v24 = vpop.eup %1158 }
 0x65f   :  { %v1161_v25 = vpop.eup %1160  ;;  %861 = vst.msk [vmem:[%s1385_s4 + $0x20] sm:$0xff] %vm856_vm2, %v852_v23  ;;  %v843_v26 = vmul.f32 0.6931472, %v1159_v24 }
 0x660   :  { %v845_v27 = vmul.f32 0.6931472, %v1161_v25 }
 0x661   :  { %v853_v29 = vsub.f32 %v1332_v53, %v843_v26 }
 0x662   :  { %v1163_v31 = vpop.eup %1162  ;;  %v854_v32 = vsub.f32 %v1334_v54, %v845_v27 }
 0x663   :  { %862 = vst.msk [vmem:[%s1385_s4 + $0x28] sm:$0xff] %vm856_vm2, %v853_v29  ;;  %v847_v33 = vmul.f32 0.6931472, %v1163_v31 }
 0x664   :  { %863 = vst.msk [vmem:[%s1385_s4 + $0x30] sm:$0xff] %vm856_vm2, %v854_v32 }
 0x665   :  { %v855_v35 = vsub.f32 %v1338_v7, %v847_v33 }
 0x667   :  { %864 = vst.msk [vmem:[%s1385_s4 + $0x38] sm:$0xff] %vm856_vm2, %v855_v35 }
 0x668   :  { %869 = vsyncpa [#allocation3], 1 }
 0x669   :  { %870 = vsyncpa [#allocation5], 1 }

</bundles_post_ra>
